<compile_context>
chip_gen: v7x
topology: tpu7x:2x2x1
jax: 0.10.0
libtpu: 0.0.40
codegen_flags: <defaults>
</compile_context>

<pallas_src>
import jax
import jax.numpy as jnp
from jax.experimental import pallas as pl
from jax.experimental.pallas import tpu as pltpu

IMAGE_RGB_MEAN = [0.485, 0.456, 0.406]
IMAGE_RGB_STD = [0.229, 0.224, 0.225]

# Baked fused-multiply-add constants:  (x - m) / s  ==  x * (1/s) + (-m/s)
_SCALE = tuple(1.0 / s for s in IMAGE_RGB_STD)
_BIAS = tuple(-m / s for m, s in zip(IMAGE_RGB_MEAN, IMAGE_RGB_STD))


def _rgb_kernel(x_ref, o_ref):
    """One (block_rows, block_cols) tile of the flattened (N*3, H*W) image."""
    block_rows = o_ref.shape[0]
    row0 = pl.program_id(0) * block_rows
    # Global row index of every sublane-row in this block -> channel = row % 3.
    rows = jax.lax.broadcasted_iota(jnp.int32, (block_rows, 1), 0) + row0
    ch = rows % 3
    scale = jnp.where(ch == 0, jnp.float32(_SCALE[0]),
            jnp.where(ch == 1, jnp.float32(_SCALE[1]), jnp.float32(_SCALE[2])))
    bias = jnp.where(ch == 0, jnp.float32(_BIAS[0]),
           jnp.where(ch == 1, jnp.float32(_BIAS[1]), jnp.float32(_BIAS[2])))
    # Cast in-kernel (fused with the FMA); output is float32.
    o_ref[...] = x_ref[...].astype(jnp.float32) * scale + bias


def _tpu_defaults():
    """(target block bytes, vmem_limit_bytes) per TPU generation."""
    try:
        kind = jax.devices()[0].device_kind.lower()
    except Exception:  # pragma: no cover - defensive only
        kind = ""
    if "v5" in kind:
        # ~820 GB/s HBM: 2 MiB steps already amortize the ~0.35 us step cost.
        return 2 << 20, 32 << 20
    if "v6" in kind:
        # ~1.4 TB/s HBM, 128 MiB physical VMEM.
        return 4 << 20, 64 << 20
    # v7x (or unknown): 3.2 TB/s HBM but only 64 MiB physical VMEM per TC.
    return 6 << 20, 48 << 20


def _choose_blocks(rows, cols, target_bytes):
    """Pick (block_rows, block_cols) honoring the (8, 128) rule and a byte cap."""
    bpe = 4  # budget against the f32 output tile (the larger of in/out tiles)

    # Columns: prefer the full, fully-contiguous width when an 8-row slab fits.
    if cols <= 128 or cols * 8 * bpe <= target_bytes:
        block_cols = cols
    else:
        cap = max(128, (target_bytes // (8 * bpe)) // 128 * 128)
        block_cols = min((cols // 128) * 128, cap)

    # Rows: largest multiple of 8 keeping the tile under the budget.
    rows_cap = max(8, (target_bytes // (block_cols * bpe)) // 8 * 8)
    if rows <= rows_cap:
        block_rows = rows  # full dim (allowed even if not a multiple of 8)
        if rows >= 16:
            # Give the v7x megacore at least two steps on the parallel axis.
            half = (pl.cdiv(rows, 2) + 7) // 8 * 8
            if half < rows:
                block_rows = half
    else:
        block_rows = rows_cap
    return block_rows, block_cols


def rgb_normalize(x: jax.Array) -> jax.Array:
    """Equivalent of RGB.forward: (x - mean) / std with per-channel stats."""
    n, c, h, w = x.shape
    assert c == 3, "RGB module expects 3 channels"

    rows, cols = n * c, h * w
    x2d = x.reshape(rows, cols)  # lane-dense 2D view (free for contiguous NCHW)

    target_bytes, vmem_limit = _tpu_defaults()
    block_rows, block_cols = _choose_blocks(rows, cols, target_bytes)
    grid = (pl.cdiv(rows, block_rows), pl.cdiv(cols, block_cols))

    out2d = pl.pallas_call(
        _rgb_kernel,
        out_shape=jax.ShapeDtypeStruct((rows, cols), jnp.float32),
        grid=grid,
        in_specs=[pl.BlockSpec((block_rows, block_cols), lambda i, j: (i, j))],
        out_specs=pl.BlockSpec((block_rows, block_cols), lambda i, j: (i, j)),
        compiler_params=pltpu.CompilerParams(
            dimension_semantics=("parallel", "parallel"),
            vmem_limit_bytes=vmem_limit,
        ),
    )(x2d)

    return out2d.reshape(n, c, h, w)


def _reference(x):
    mean = jnp.asarray(IMAGE_RGB_MEAN, jnp.float32).reshape(1, 3, 1, 1)
    std = jnp.asarray(IMAGE_RGB_STD, jnp.float32).reshape(1, 3, 1, 1)
    return (x.astype(jnp.float32) - mean) / std


if __name__ == "__main__":
    key = jax.random.PRNGKey(0)

    # Primary small test, matching the module's expected NCHW 3-channel input.
    x = jax.random.uniform(key, (2, 3, 16, 16), dtype=jnp.float32)
    out = jax.block_until_ready(rgb_normalize(x))
    ref = _reference(x)
    assert out.shape == x.shape and out.dtype == jnp.float32
    assert jnp.allclose(out, ref, rtol=1e-5, atol=1e-6)

    # Multi-step grid along rows (exercises cdiv partial blocks + megacore split).
    x2 = jax.random.uniform(jax.random.PRNGKey(1), (8, 3, 64, 96), dtype=jnp.float32)
    out2 = jax.block_until_ready(rgb_normalize(x2))
    assert jnp.allclose(out2, _reference(x2), rtol=1e-5, atol=1e-6)

    # In-kernel dtype cast path (bf16 in -> f32 out), non-multiple-of-128 width.
    x3 = jax.random.uniform(jax.random.PRNGKey(2), (2, 3, 20, 50)).astype(jnp.bfloat16)
    out3 = jax.block_until_ready(rgb_normalize(x3))
    assert out3.dtype == jnp.float32
    assert jnp.allclose(out3, _reference(x3), rtol=3e-2, atol=3e-2)

    print("KERNEL_OK")
</pallas_src>

<mosaic_0001>
module attributes {stable_mosaic.version = 11 : i64} {
  func.func @_rgb_kernel(%arg0: i32, %arg1: i32, %arg2: memref<6x256xf32, #tpu.memory_space<vmem>>, %arg3: memref<6x256xf32, #tpu.memory_space<vmem>>) attributes {dimension_semantics = [#tpu.dimension_semantics<parallel>, #tpu.dimension_semantics<parallel>], iteration_bounds = array<i64: 1, 1>, scalar_prefetch = 0 : i64, scratch_operands = 0 : i64, tpu.core_type = #tpu.core_type<tc>, window_params = [{transform_indices = @transform_0, window_bounds = array<i64: 6, 256>}, {transform_indices = @transform_1, window_bounds = array<i64: 6, 256>}]} {
    %c6_i32 = arith.constant 6 : i32
    %0 = arith.muli %arg0, %c6_i32 : i32
    %1 = tpu.iota {dimensions = array<i32: 0>} : vector<6x1xi32>
    %2 = vector.broadcast %0 : i32 to vector<6x1xi32>
    %3 = arith.addi %1, %2 : vector<6x1xi32>
    %c3_i32 = arith.constant 3 : i32
    %c0_i32 = arith.constant 0 : i32
    %4 = arith.cmpi eq, %c3_i32, %c0_i32 : i32
    %c1_i32 = arith.constant 1 : i32
    %5 = arith.select %4, %c1_i32, %c3_i32 : i32
    %6 = vector.broadcast %5 : i32 to vector<6x1xi32>
    %7 = arith.remsi %3, %6 : vector<6x1xi32>
    %c0_i32_0 = arith.constant 0 : i32
    %8 = vector.broadcast %c0_i32_0 : i32 to vector<6x1xi32>
    %9 = arith.cmpi ne, %7, %8 : vector<6x1xi32>
    %c0_i32_1 = arith.constant 0 : i32
    %10 = vector.broadcast %c0_i32_1 : i32 to vector<6x1xi32>
    %11 = arith.cmpi slt, %7, %10 : vector<6x1xi32>
    %c0_i32_2 = arith.constant 0 : i32
    %12 = arith.cmpi slt, %5, %c0_i32_2 : i32
    %13 = vector.broadcast %12 : i1 to vector<6x1xi1>
    %14 = vector.broadcast %13 : vector<6x1xi1> to vector<6x1xi1>
    %15 = arith.xori %11, %14 : vector<6x1xi1>
    %16 = arith.andi %15, %9 : vector<6x1xi1>
    %17 = vector.broadcast %5 : i32 to vector<6x1xi32>
    %18 = arith.addi %7, %17 : vector<6x1xi32>
    %19 = arith.select %16, %18, %7 : vector<6x1xi1>, vector<6x1xi32>
    %c0_i32_3 = arith.constant 0 : i32
    %20 = vector.broadcast %c0_i32_3 : i32 to vector<6x1xi32>
    %21 = arith.cmpi eq, %19, %20 : vector<6x1xi32>
    %c1_i32_4 = arith.constant 1 : i32
    %22 = vector.broadcast %c1_i32_4 : i32 to vector<6x1xi32>
    %23 = arith.cmpi eq, %19, %22 : vector<6x1xi32>
    %cst = arith.constant 4.46428585 : f32
    %cst_5 = arith.constant 4.44444466 : f32
    %24 = vector.broadcast %cst : f32 to vector<6x1xf32>
    %25 = vector.broadcast %cst_5 : f32 to vector<6x1xf32>
    %26 = arith.select %23, %24, %25 : vector<6x1xi1>, vector<6x1xf32>
    %cst_6 = arith.constant 4.36681223 : f32
    %27 = vector.broadcast %cst_6 : f32 to vector<6x1xf32>
    %28 = arith.select %21, %27, %26 : vector<6x1xi1>, vector<6x1xf32>
    %c0_i32_7 = arith.constant 0 : i32
    %29 = vector.broadcast %c0_i32_7 : i32 to vector<6x1xi32>
    %30 = arith.cmpi eq, %19, %29 : vector<6x1xi32>
    %c1_i32_8 = arith.constant 1 : i32
    %31 = vector.broadcast %c1_i32_8 : i32 to vector<6x1xi32>
    %32 = arith.cmpi eq, %19, %31 : vector<6x1xi32>
    %cst_9 = arith.constant -2.03571439 : f32
    %cst_10 = arith.constant -1.80444443 : f32
    %33 = vector.broadcast %cst_9 : f32 to vector<6x1xf32>
    %34 = vector.broadcast %cst_10 : f32 to vector<6x1xf32>
    %35 = arith.select %32, %33, %34 : vector<6x1xi1>, vector<6x1xf32>
    %cst_11 = arith.constant -2.11790395 : f32
    %36 = vector.broadcast %cst_11 : f32 to vector<6x1xf32>
    %37 = arith.select %30, %36, %35 : vector<6x1xi1>, vector<6x1xf32>
    %c0 = arith.constant 0 : index
    %c0_12 = arith.constant 0 : index
    %38 = vector.load %arg2[%c0, %c0_12] : memref<6x256xf32, #tpu.memory_space<vmem>>, vector<6x256xf32>
    %39 = vector.broadcast %28 : vector<6x1xf32> to vector<6x256xf32>
    %40 = arith.mulf %38, %39 : vector<6x256xf32>
    %41 = vector.broadcast %37 : vector<6x1xf32> to vector<6x256xf32>
    %42 = arith.addf %40, %41 : vector<6x256xf32>
    %c0_13 = arith.constant 0 : index
    %c0_14 = arith.constant 0 : index
    %43 = vector.load %arg3[%c0_13, %c0_14] : memref<6x256xf32, #tpu.memory_space<vmem>>, vector<6x256xf32>
    tpu.vector_store %arg3[%c0_13, %c0_14], %42 {strides = array<i32>} : memref<6x256xf32, #tpu.memory_space<vmem>>, vector<6x256xf32>,
    return
  }
  func.func @transform_0(%arg0: i32, %arg1: i32) -> (i32, i32) {
    %c0_i32 = arith.constant 0 : i32
    return %arg0, %arg1 : i32, i32
  }
  func.func @transform_1(%arg0: i32, %arg1: i32) -> (i32, i32) {
    %c0_i32 = arith.constant 0 : i32
    return %arg0, %arg1 : i32, i32
  }
}

</mosaic_0001>

<bundles_post_ra>
// kernel: tpu_custom_call.1
= control target key start
LH: loop header
LB: loop body
LE: loop exit
PB: predicated region body
PF: predicated region fallthrough
CT: control target
= control target key end

     0   :  { %6 = vsyncpa [#allocation3], 0  ;;  %s167_s0 = inlined_call_operand.hbm [shape: f32[6,256], index: 0, kind: input, shape index: {}]   ;;  %s168_s1 = inlined_call_operand.hbm [shape: f32[6,256], index: 1, kind: output, shape index: {}]  }
   0x1   :  { %7 = vsyncpa [#allocation4], 0  ;;  %s125_s6 = smov [#allocation2]   ;;  %s77_s10 = scalar_lea.hbm %s167_s0, 256 }
   0x2   :  { %s14_s7 = sshll.u32 %s125_s6, 4  ;;  %p78_p0 = scmp.ne.s32.totalorder %s167_s0, %s77_s10  ;;  %s15_s7 = int_to_ptr.vmem [resolvable:$true] %s14_s7 }
   0x3   :  { %p81_p1 = scmp.lt.u32.totalorder %s77_s10, %s167_s0 }
   0x5   :  { %p83_p2 = pnand %p81_p1, %p78_p0 }
   0x7   :  { %86 = shalt.err (!%p83_p2)
}
   0x8   :  { %s87_s15 = scalar_lea.vmem %s15_s7, 256  ;;  %p92_p4 = scmp.lt.s32.totalorder %s15_s7, %s15_s7 }
   0x9   :  { %p88_p3 = scmp.ne.s32.totalorder %s15_s7, %s87_s15  ;;  %p93_p5 = scmp.lt.s32.totalorder %s87_s15, %s87_s15 }
   0xb   :  { %p94_p6 = por %p93_p5, %p92_p4 }
   0xd   :  { %p95_p7 = pnand %p94_p6, %p88_p3 }
   0xf   :  { %98 = shalt.err (!%p95_p7)
}
  0x10   :  { %17 = dma.hbm_to_vmem [thread:$0]  %s167_s0, 256, %s15_s7, [#allocation3]  }
  0x11   :  { %121 = dma.done.wait [#allocation3], 256  }
  0x12   :  { %122 = vsyncadd [#allocation3], 4294967040  ;;  %v22_v0 = vlaneseq  ;;  %v48_v9 = vld [vmem:[#allocation2] sm:$0x3f]  ;;  %v49_v10 = vld [vmem:[#allocation2 + $0x8] sm:$0x3f] }
  0x13   :  { %v126_v11 = vmov 4.4444447   ;;  %v127_v13 = vmov -1.8044444   ;;  %s128_s0 = smov [#allocation5]  }
  0x14   :  { %v23_v1 = vshrl.u32 %v22_v0, 7  ;;  %s62_s18 = sshll.u32 %s128_s0, 4  ;;  %s63_s18 = int_to_ptr.vmem [resolvable:$true] %s62_s18 }
  0x15   :  { %s99_s19 = scalar_lea.vmem %s63_s18, 256  ;;  %p104_p9 = scmp.lt.s32.totalorder %s63_s18, %s63_s18 }
  0x16   :  { %v151_v2 = vmul.u32.u64.low 2863311531, %v23_v1  ;;  %v152_v3 = vmul.u32.u64.high 2863311531, %v23_v1, %v151_v2  ;;  %p100_p8 = scmp.ne.s32.totalorder %s63_s18, %s99_s19  ;;  %p105_p10 = scmp.lt.s32.totalorder %s99_s19, %s99_s19 }
  0x18   :  { %v32_v4 = vshrl.u32 %v152_v3, 1  ;;  %p106_p11 = por %p105_p10, %p104_p9 }
  0x1a   :  { %v33_v5 = vmul.u32 3, %v32_v4  ;;  %p107_p12 = pnand %p106_p11, %p100_p8 }
  0x1c   :  { %v34_v6 = vsub.s32 %v23_v1, %v33_v5 }
  0x1e   :  { %vm37_vm0 = vcmp.ne.s32.totalorder %v34_v6, 0  ;;  %vm38_vm1 = vcmp.lt.s32.totalorder %v34_v6, 0  ;;  %v40_v7 = vadd.s32 3, %v34_v6 }
  0x1f   :  { %vm39_vm2 = vmand %vm38_vm1, %vm37_vm0 }
  0x20   :  { %v41_v8 = vsel %vm39_vm2, %v40_v7, %v34_v6 }
  0x21   :  { %vm42_vm3 = vcmp.eq.s32.totalorder %v41_v8, 0  ;;  %vm43_vm4 = vcmp.eq.s32.totalorder %v41_v8, 1 }
  0x22   :  { %v44_v12 = vsel %vm43_vm4, 4.464286, %v126_v11  ;;  %v46_v14 = vsel %vm43_vm4, -2.0357144, %v127_v13 }
  0x23   :  { %v45_v15 = vsel %vm42_vm3, 4.366812, %v44_v12  ;;  %v47_v16 = vsel %vm42_vm3, -2.117904, %v46_v14 }
  0x24   :  { %v50_v17 = vmul.f32 %v48_v9, %v45_v15  ;;  %v51_v18 = vmul.f32 %v49_v10, %v45_v15 }
  0x26   :  { %v52_v19 = vadd.f32 %v50_v17, %v47_v16  ;;  %v53_v20 = vadd.f32 %v51_v18, %v47_v16 }
  0x28   :  { %54 = vst [vmem:[#allocation5] sm:$0x3f] %v52_v19  ;;  %55 = vst [vmem:[#allocation5 + $0x8] sm:$0x3f] %v53_v20 }
  0x29   :  { %110 = shalt.err (!%p107_p12)
}
  0x2a   :  { %s111_s22 = scalar_lea.hbm %s168_s1, 256 }
  0x2b   :  { %p112_p13 = scmp.ne.s32.totalorder %s168_s1, %s111_s22  ;;  %p115_p0 = scmp.lt.u32.totalorder %s111_s22, %s168_s1 }
  0x2d   :  { %p117_p1 = pnand %p115_p0, %p112_p13 }
  0x2f   :  { %120 = shalt.err (!%p117_p1)
}
  0x30   :  { %65 = dma.vmem_to_hbm [thread:$0]  %s63_s18, 256, %s168_s1, [#allocation4]  }
  0x31   :  { %123 = dma.done.wait [#allocation4], 256  }
  0x32   :  { %124 = vsyncadd [#allocation4], 4294967040 }
  0x33   :  { %69 = vsyncpa [#allocation3], 1 }
  0x34   :  { %70 = vsyncpa [#allocation4], 1 }

</bundles_post_ra>
